<compile_context>
chip_gen: v7x
topology: tpu7x:2x2x1
jax: 0.10.0
libtpu: 0.0.40
codegen_flags: <defaults>
</compile_context>

<pallas_src>
import functools

import jax
import jax.numpy as jnp
from jax import lax
from jax.experimental import pallas as pl
from jax.experimental.pallas import tpu as pltpu

_LANES = 128
_SUBLANES = 8


def _static_transform_kernel(w_ref, b_ref, x_ref, o_ref, *, chunk):
    """tanh(W^T x + b) on a (bb, C, rows_tile, 128) sublane/lane-dense tile.

    w_ref: (C, C_out) f32 in SMEM (scalar reads)
    b_ref: (C_out,)   f32 in SMEM (scalar reads)
    x_ref: (bb, C,    rows_tile, 128) VMEM
    o_ref: (bb, C_out, rows_tile, 128) VMEM
    """
    bb, c_in, rows_tile, _ = x_ref.shape
    c_out = o_ref.shape[1]

    def process(r0, nrows):
        # One sub-chunk: (nrows, 128) per channel -> dense vregs, bounded live set.
        for b in range(bb):                      # static unroll, bb is small
            xs = [x_ref[b, c, pl.ds(r0, nrows), :].astype(jnp.float32)
                  for c in range(c_in)]          # C streamed channel loads
            for co in range(c_out):              # static unroll over out channels
                acc = xs[0] * w_ref[0, co]
                for c in range(1, c_in):         # C VPU FMAs on dense vregs
                    acc = acc + xs[c] * w_ref[c, co]
                # Direct per-channel store: full-width unmasked vst, no repack.
                o_ref[b, co, pl.ds(r0, nrows), :] = jnp.tanh(
                    acc + b_ref[co]).astype(o_ref.dtype)

    n_full = rows_tile // chunk
    rem = rows_tile - n_full * chunk

    if n_full == 1:
        process(0, chunk)
    else:
        def body(i, carry):
            process(pl.multiple_of(i * chunk, chunk), chunk)
            return carry
        lax.fori_loop(0, n_full, body, 0)

    if rem:
        process(n_full * chunk, rem)


def static_transformation_layer(x_nchw, weight, bias, *, target_tile_bytes=2 << 20):
    """Apply the static transformation tanh(W^T @ x_channels + b) per pixel.

    Args:
      x_nchw: [B, C, H, W] input (matches the PyTorch NCHW convention).
      weight: [C, C_out] fixed (non-learnable) projection.
      bias:   [C_out] fixed bias.
    Returns:
      [B, C_out, H, W] transformed tensor.
    """
    B, C, H, W = x_nchw.shape
    C_out = weight.shape[1]
    HW = H * W

    weight = weight.astype(jnp.float32)
    bias = bias.astype(jnp.float32)

    # Lane/sublane-dense layout: HW -> (rows, 128) slabs.  The reshape is free
    # (spatial axis is innermost); pad HW up to a lane multiple if needed.
    pad = (-HW) % _LANES
    x3 = x_nchw.reshape(B, C, HW)
    if pad:
        x3 = jnp.pad(x3, ((0, 0), (0, 0), (0, pad)))
    rows = (HW + pad) // _LANES
    x4 = x3.reshape(B, C, rows, _LANES)

    itemsize = jnp.dtype(x_nchw.dtype).itemsize
    in_bytes_per_row = C * _LANES * itemsize

    # Spatial tile: ~target_tile_bytes of input per grid step, rounded to a
    # sublane multiple (or the full rows axis), so blocks satisfy (8,128).
    rows_tile = max(1, target_tile_bytes // in_bytes_per_row)
    if rows_tile >= rows:
        rows_tile = rows
    else:
        rows_tile = max(_SUBLANES, (rows_tile // _SUBLANES) * _SUBLANES)
    n_row_tiles = pl.cdiv(rows, rows_tile)

    # Batch blocking for tiny feature maps (amortize per-step overhead), but
    # keep >= 2 total grid steps so both v7x TensorCores get work.
    bb = 1
    if n_row_tiles == 1 and B > 1:
        bb = max(1, min(B, target_tile_bytes // max(rows * in_bytes_per_row, 1)))
        while bb > 1 and B % bb != 0:
            bb -= 1
        while bb > 1 and (B // bb) * n_row_tiles < 2:
            bb = max(1, bb // 2)
            while bb > 1 and B % bb != 0:
                bb -= 1
    n_b_tiles = B // bb

    # Inner streaming sub-chunk: caps live vregs at ~(C+1)*chunk/8 per output.
    chunk = rows_tile
    for cand in (64, 32, 16, 8):
        if rows_tile >= cand:
            chunk = cand
            break

    # Explicit scoped-VMEM budget (double-buffered in + out, plus headroom).
    block_in_bytes = bb * C * rows_tile * _LANES * itemsize
    block_out_bytes = bb * C_out * rows_tile * _LANES * itemsize
    vmem_limit = int(2.5 * (block_in_bytes + block_out_bytes)) + (4 << 20)
    vmem_limit = max(16 << 20, min(vmem_limit, 64 << 20))

    kernel = functools.partial(_static_transform_kernel, chunk=chunk)

    out4 = pl.pallas_call(
        kernel,
        out_shape=jax.ShapeDtypeStruct((B, C_out, rows, _LANES), x_nchw.dtype),
        grid=(n_b_tiles, n_row_tiles),
        in_specs=[
            pl.BlockSpec(memory_space=pltpu.MemorySpace.SMEM),   # weight (C, C_out)
            pl.BlockSpec(memory_space=pltpu.MemorySpace.SMEM),   # bias (C_out,)
            pl.BlockSpec((bb, C, rows_tile, _LANES), lambda i, j: (i, 0, j, 0)),
        ],
        out_specs=pl.BlockSpec((bb, C_out, rows_tile, _LANES),
                               lambda i, j: (i, 0, j, 0)),
        compiler_params=pltpu.CompilerParams(
            dimension_semantics=("parallel", "parallel"),
            vmem_limit_bytes=vmem_limit,
        ),
    )(weight, bias, x4)

    # Free reshape back to NCHW (drop the lane padding, if any).
    out3 = out4.reshape(B, C_out, rows * _LANES)
    if pad:
        out3 = out3[:, :, :HW]
    return out3.reshape(B, C_out, H, W)


def _reference(x, weight, bias):
    return jnp.tanh(jnp.einsum("bchw,co->bohw", x, weight)
                    + bias[None, :, None, None])


if __name__ == "__main__":
    key = jax.random.PRNGKey(0)
    kx, kw, kb = jax.random.split(key, 3)

    B, C, H, W = 2, 4, 16, 16
    C_out = 4

    x = jax.random.normal(kx, (B, C, H, W), dtype=jnp.float32)
    # Deterministic "static" (non-learnable) transformation parameters.
    weight = jax.random.normal(kw, (C, C_out), dtype=jnp.float32) * 0.5
    bias = jax.random.normal(kb, (C_out,), dtype=jnp.float32) * 0.1

    out = static_transformation_layer(x, weight, bias)
    out = jax.block_until_ready(out)
    ref = _reference(x, weight, bias)
    assert out.shape == (B, C_out, H, W)
    assert jnp.allclose(out, ref, atol=1e-5, rtol=1e-5)

    # Extra small-shape checks: multi-row dense tiles, and non-128-multiple HW.
    x2 = jax.random.normal(kx, (2, 4, 32, 32), dtype=jnp.float32)
    out2 = jax.block_until_ready(static_transformation_layer(x2, weight, bias))
    assert jnp.allclose(out2, _reference(x2, weight, bias), atol=1e-5, rtol=1e-5)

    x3 = jax.random.normal(kb, (1, 4, 10, 10), dtype=jnp.float32)
    out3 = jax.block_until_ready(static_transformation_layer(x3, weight, bias))
    assert jnp.allclose(out3, _reference(x3, weight, bias), atol=1e-5, rtol=1e-5)

    print("KERNEL_OK")
</pallas_src>

<mosaic_0001>
module attributes {stable_mosaic.version = 11 : i64} {
  func.func @_static_transform_kernel(%arg0: i32, %arg1: i32, %arg2: memref<4x4xf32, #tpu.memory_space<smem>>, %arg3: memref<4xf32, #tpu.memory_space<smem>>, %arg4: memref<1x4x2x128xf32, #tpu.memory_space<vmem>>, %arg5: memref<1x4x2x128xf32, #tpu.memory_space<vmem>>) attributes {dimension_semantics = [#tpu.dimension_semantics<parallel>, #tpu.dimension_semantics<parallel>], iteration_bounds = array<i64: 2, 1>, scalar_prefetch = 0 : i64, scratch_operands = 0 : i64, tpu.core_type = #tpu.core_type<tc>, window_params = [{transform_indices = @transform_0, window_bounds = array<i64: 4, 4>}, {transform_indices = @transform_1, window_bounds = array<i64: 4>}, {transform_indices = @transform_2, window_bounds = array<i64: 1, 4, 2, 128>}, {transform_indices = @transform_3, window_bounds = array<i64: 1, 4, 2, 128>}]} {
    %c0 = arith.constant 0 : index
    %c0_0 = arith.constant 0 : index
    %c0_1 = arith.constant 0 : index
    %c0_2 = arith.constant 0 : index
    %0 = vector.load %arg4[%c0, %c0_0, %c0_1, %c0_2] : memref<1x4x2x128xf32, #tpu.memory_space<vmem>>, vector<1x1x2x128xf32>
    %1 = vector.shape_cast %0 : vector<1x1x2x128xf32> to vector<2x128xf32>
    %c0_3 = arith.constant 0 : index
    %c1 = arith.constant 1 : index
    %c0_4 = arith.constant 0 : index
    %c0_5 = arith.constant 0 : index
    %2 = vector.load %arg4[%c0_3, %c1, %c0_4, %c0_5] : memref<1x4x2x128xf32, #tpu.memory_space<vmem>>, vector<1x1x2x128xf32>
    %3 = vector.shape_cast %2 : vector<1x1x2x128xf32> to vector<2x128xf32>
    %c0_6 = arith.constant 0 : index
    %c2 = arith.constant 2 : index
    %c0_7 = arith.constant 0 : index
    %c0_8 = arith.constant 0 : index
    %4 = vector.load %arg4[%c0_6, %c2, %c0_7, %c0_8] : memref<1x4x2x128xf32, #tpu.memory_space<vmem>>, vector<1x1x2x128xf32>
    %5 = vector.shape_cast %4 : vector<1x1x2x128xf32> to vector<2x128xf32>
    %c0_9 = arith.constant 0 : index
    %c3 = arith.constant 3 : index
    %c0_10 = arith.constant 0 : index
    %c0_11 = arith.constant 0 : index
    %6 = vector.load %arg4[%c0_9, %c3, %c0_10, %c0_11] : memref<1x4x2x128xf32, #tpu.memory_space<vmem>>, vector<1x1x2x128xf32>
    %7 = vector.shape_cast %6 : vector<1x1x2x128xf32> to vector<2x128xf32>
    %c0_12 = arith.constant 0 : index
    %c0_13 = arith.constant 0 : index
    %8 = memref.load %arg2[%c0_12, %c0_13] : memref<4x4xf32, #tpu.memory_space<smem>>
    %9 = vector.broadcast %8 : f32 to vector<2x128xf32>
    %10 = arith.mulf %1, %9 : vector<2x128xf32>
    %c1_14 = arith.constant 1 : index
    %c0_15 = arith.constant 0 : index
    %11 = memref.load %arg2[%c1_14, %c0_15] : memref<4x4xf32, #tpu.memory_space<smem>>
    %12 = vector.broadcast %11 : f32 to vector<2x128xf32>
    %13 = arith.mulf %3, %12 : vector<2x128xf32>
    %14 = arith.addf %10, %13 : vector<2x128xf32>
    %c2_16 = arith.constant 2 : index
    %c0_17 = arith.constant 0 : index
    %15 = memref.load %arg2[%c2_16, %c0_17] : memref<4x4xf32, #tpu.memory_space<smem>>
    %16 = vector.broadcast %15 : f32 to vector<2x128xf32>
    %17 = arith.mulf %5, %16 : vector<2x128xf32>
    %18 = arith.addf %14, %17 : vector<2x128xf32>
    %c3_18 = arith.constant 3 : index
    %c0_19 = arith.constant 0 : index
    %19 = memref.load %arg2[%c3_18, %c0_19] : memref<4x4xf32, #tpu.memory_space<smem>>
    %20 = vector.broadcast %19 : f32 to vector<2x128xf32>
    %21 = arith.mulf %7, %20 : vector<2x128xf32>
    %22 = arith.addf %18, %21 : vector<2x128xf32>
    %c0_20 = arith.constant 0 : index
    %23 = memref.load %arg3[%c0_20] : memref<4xf32, #tpu.memory_space<smem>>
    %24 = vector.broadcast %23 : f32 to vector<2x128xf32>
    %25 = arith.addf %22, %24 : vector<2x128xf32>
    %26 = math.tanh %25 : vector<2x128xf32>
    %c0_21 = arith.constant 0 : index
    %c0_22 = arith.constant 0 : index
    %c0_23 = arith.constant 0 : index
    %c0_24 = arith.constant 0 : index
    %27 = vector.load %arg5[%c0_21, %c0_22, %c0_23, %c0_24] : memref<1x4x2x128xf32, #tpu.memory_space<vmem>>, vector<1x1x2x128xf32>
    %28 = vector.shape_cast %27 : vector<1x1x2x128xf32> to vector<2x128xf32>
    %29 = vector.shape_cast %26 : vector<2x128xf32> to vector<1x1x2x128xf32>
    tpu.vector_store %arg5[%c0_21, %c0_22, %c0_23, %c0_24], %29 {strides = array<i32>} : memref<1x4x2x128xf32, #tpu.memory_space<vmem>>, vector<1x1x2x128xf32>,
    %c0_25 = arith.constant 0 : index
    %c1_26 = arith.constant 1 : index
    %30 = memref.load %arg2[%c0_25, %c1_26] : memref<4x4xf32, #tpu.memory_space<smem>>
    %31 = vector.broadcast %30 : f32 to vector<2x128xf32>
    %32 = arith.mulf %1, %31 : vector<2x128xf32>
    %c1_27 = arith.constant 1 : index
    %c1_28 = arith.constant 1 : index
    %33 = memref.load %arg2[%c1_27, %c1_28] : memref<4x4xf32, #tpu.memory_space<smem>>
    %34 = vector.broadcast %33 : f32 to vector<2x128xf32>
    %35 = arith.mulf %3, %34 : vector<2x128xf32>
    %36 = arith.addf %32, %35 : vector<2x128xf32>
    %c2_29 = arith.constant 2 : index
    %c1_30 = arith.constant 1 : index
    %37 = memref.load %arg2[%c2_29, %c1_30] : memref<4x4xf32, #tpu.memory_space<smem>>
    %38 = vector.broadcast %37 : f32 to vector<2x128xf32>
    %39 = arith.mulf %5, %38 : vector<2x128xf32>
    %40 = arith.addf %36, %39 : vector<2x128xf32>
    %c3_31 = arith.constant 3 : index
    %c1_32 = arith.constant 1 : index
    %41 = memref.load %arg2[%c3_31, %c1_32] : memref<4x4xf32, #tpu.memory_space<smem>>
    %42 = vector.broadcast %41 : f32 to vector<2x128xf32>
    %43 = arith.mulf %7, %42 : vector<2x128xf32>
    %44 = arith.addf %40, %43 : vector<2x128xf32>
    %c1_33 = arith.constant 1 : index
    %45 = memref.load %arg3[%c1_33] : memref<4xf32, #tpu.memory_space<smem>>
    %46 = vector.broadcast %45 : f32 to vector<2x128xf32>
    %47 = arith.addf %44, %46 : vector<2x128xf32>
    %48 = math.tanh %47 : vector<2x128xf32>
    %c0_34 = arith.constant 0 : index
    %c1_35 = arith.constant 1 : index
    %c0_36 = arith.constant 0 : index
    %c0_37 = arith.constant 0 : index
    %49 = vector.load %arg5[%c0_34, %c1_35, %c0_36, %c0_37] : memref<1x4x2x128xf32, #tpu.memory_space<vmem>>, vector<1x1x2x128xf32>
    %50 = vector.shape_cast %49 : vector<1x1x2x128xf32> to vector<2x128xf32>
    %51 = vector.shape_cast %48 : vector<2x128xf32> to vector<1x1x2x128xf32>
    tpu.vector_store %arg5[%c0_34, %c1_35, %c0_36, %c0_37], %51 {strides = array<i32>} : memref<1x4x2x128xf32, #tpu.memory_space<vmem>>, vector<1x1x2x128xf32>,
    %c0_38 = arith.constant 0 : index
    %c2_39 = arith.constant 2 : index
    %52 = memref.load %arg2[%c0_38, %c2_39] : memref<4x4xf32, #tpu.memory_space<smem>>
    %53 = vector.broadcast %52 : f32 to vector<2x128xf32>
    %54 = arith.mulf %1, %53 : vector<2x128xf32>
    %c1_40 = arith.constant 1 : index
    %c2_41 = arith.constant 2 : index
    %55 = memref.load %arg2[%c1_40, %c2_41] : memref<4x4xf32, #tpu.memory_space<smem>>
    %56 = vector.broadcast %55 : f32 to vector<2x128xf32>
    %57 = arith.mulf %3, %56 : vector<2x128xf32>
    %58 = arith.addf %54, %57 : vector<2x128xf32>
    %c2_42 = arith.constant 2 : index
    %c2_43 = arith.constant 2 : index
    %59 = memref.load %arg2[%c2_42, %c2_43] : memref<4x4xf32, #tpu.memory_space<smem>>
    %60 = vector.broadcast %59 : f32 to vector<2x128xf32>
    %61 = arith.mulf %5, %60 : vector<2x128xf32>
    %62 = arith.addf %58, %61 : vector<2x128xf32>
    %c3_44 = arith.constant 3 : index
    %c2_45 = arith.constant 2 : index
    %63 = memref.load %arg2[%c3_44, %c2_45] : memref<4x4xf32, #tpu.memory_space<smem>>
    %64 = vector.broadcast %63 : f32 to vector<2x128xf32>
    %65 = arith.mulf %7, %64 : vector<2x128xf32>
    %66 = arith.addf %62, %65 : vector<2x128xf32>
    %c2_46 = arith.constant 2 : index
    %67 = memref.load %arg3[%c2_46] : memref<4xf32, #tpu.memory_space<smem>>
    %68 = vector.broadcast %67 : f32 to vector<2x128xf32>
    %69 = arith.addf %66, %68 : vector<2x128xf32>
    %70 = math.tanh %69 : vector<2x128xf32>
    %c0_47 = arith.constant 0 : index
    %c2_48 = arith.constant 2 : index
    %c0_49 = arith.constant 0 : index
    %c0_50 = arith.constant 0 : index
    %71 = vector.load %arg5[%c0_47, %c2_48, %c0_49, %c0_50] : memref<1x4x2x128xf32, #tpu.memory_space<vmem>>, vector<1x1x2x128xf32>
    %72 = vector.shape_cast %71 : vector<1x1x2x128xf32> to vector<2x128xf32>
    %73 = vector.shape_cast %70 : vector<2x128xf32> to vector<1x1x2x128xf32>
    tpu.vector_store %arg5[%c0_47, %c2_48, %c0_49, %c0_50], %73 {strides = array<i32>} : memref<1x4x2x128xf32, #tpu.memory_space<vmem>>, vector<1x1x2x128xf32>,
    %c0_51 = arith.constant 0 : index
    %c3_52 = arith.constant 3 : index
    %74 = memref.load %arg2[%c0_51, %c3_52] : memref<4x4xf32, #tpu.memory_space<smem>>
    %75 = vector.broadcast %74 : f32 to vector<2x128xf32>
    %76 = arith.mulf %1, %75 : vector<2x128xf32>
    %c1_53 = arith.constant 1 : index
    %c3_54 = arith.constant 3 : index
    %77 = memref.load %arg2[%c1_53, %c3_54] : memref<4x4xf32, #tpu.memory_space<smem>>
    %78 = vector.broadcast %77 : f32 to vector<2x128xf32>
    %79 = arith.mulf %3, %78 : vector<2x128xf32>
    %80 = arith.addf %76, %79 : vector<2x128xf32>
    %c2_55 = arith.constant 2 : index
    %c3_56 = arith.constant 3 : index
    %81 = memref.load %arg2[%c2_55, %c3_56] : memref<4x4xf32, #tpu.memory_space<smem>>
    %82 = vector.broadcast %81 : f32 to vector<2x128xf32>
    %83 = arith.mulf %5, %82 : vector<2x128xf32>
    %84 = arith.addf %80, %83 : vector<2x128xf32>
    %c3_57 = arith.constant 3 : index
    %c3_58 = arith.constant 3 : index
    %85 = memref.load %arg2[%c3_57, %c3_58] : memref<4x4xf32, #tpu.memory_space<smem>>
    %86 = vector.broadcast %85 : f32 to vector<2x128xf32>
    %87 = arith.mulf %7, %86 : vector<2x128xf32>
    %88 = arith.addf %84, %87 : vector<2x128xf32>
    %c3_59 = arith.constant 3 : index
    %89 = memref.load %arg3[%c3_59] : memref<4xf32, #tpu.memory_space<smem>>
    %90 = vector.broadcast %89 : f32 to vector<2x128xf32>
    %91 = arith.addf %88, %90 : vector<2x128xf32>
    %92 = math.tanh %91 : vector<2x128xf32>
    %c0_60 = arith.constant 0 : index
    %c3_61 = arith.constant 3 : index
    %c0_62 = arith.constant 0 : index
    %c0_63 = arith.constant 0 : index
    %93 = vector.load %arg5[%c0_60, %c3_61, %c0_62, %c0_63] : memref<1x4x2x128xf32, #tpu.memory_space<vmem>>, vector<1x1x2x128xf32>
    %94 = vector.shape_cast %93 : vector<1x1x2x128xf32> to vector<2x128xf32>
    %95 = vector.shape_cast %92 : vector<2x128xf32> to vector<1x1x2x128xf32>
    tpu.vector_store %arg5[%c0_60, %c3_61, %c0_62, %c0_63], %95 {strides = array<i32>} : memref<1x4x2x128xf32, #tpu.memory_space<vmem>>, vector<1x1x2x128xf32>,
    return
  }
  func.func @transform_0(%arg0: i32, %arg1: i32) -> (i32, i32) {
    %c0_i32 = arith.constant 0 : i32
    %c0_i32_0 = arith.constant 0 : i32
    %c0_i32_1 = arith.constant 0 : i32
    return %c0_i32, %c0_i32_0 : i32, i32
  }
  func.func @transform_1(%arg0: i32, %arg1: i32) -> i32 {
    %c0_i32 = arith.constant 0 : i32
    %c0_i32_0 = arith.constant 0 : i32
    return %c0_i32 : i32
  }
  func.func @transform_2(%arg0: i32, %arg1: i32) -> (i32, i32, i32, i32) {
    %c0_i32 = arith.constant 0 : i32
    %c0_i32_0 = arith.constant 0 : i32
    %c0_i32_1 = arith.constant 0 : i32
    return %arg0, %c0_i32, %arg1, %c0_i32_0 : i32, i32, i32, i32
  }
  func.func @transform_3(%arg0: i32, %arg1: i32) -> (i32, i32, i32, i32) {
    %c0_i32 = arith.constant 0 : i32
    %c0_i32_0 = arith.constant 0 : i32
    %c0_i32_1 = arith.constant 0 : i32
    return %arg0, %c0_i32, %arg1, %c0_i32_0 : i32, i32, i32, i32
  }
}

</mosaic_0001>

<bundles_post_ra>
// kernel: tpu_custom_call.1
= control target key start
LH: loop header
LB: loop body
LE: loop exit
PB: predicated region body
PF: predicated region fallthrough
CT: control target
= control target key end

     0   :  { %8 = vsyncpa [#allocation5], 0  ;;  %s1019_s0 = inlined_call_operand.hbm [shape: f32[4,4], index: 0, kind: input, shape index: {}]   ;;  %s1020_s1 = inlined_call_operand.vmem [shape: f32[4], index: 1, kind: input, shape index: {}]   ;;  %s1021_s2 = inlined_call_operand.hbm [shape: f32[2,4,2,128], index: 2, kind: input, shape index: {}]   ;;  %s1022_s3 = inlined_call_operand.hbm [shape: f32[2,4,2,128], index: 3, kind: output, shape index: {}]  }
   0x1   :  { %9 = vsyncpa [#allocation6], 0 }
   0x2   :  { %10 = vsyncpa [#allocation3], 0 }
   0x3   :  { %12 = vsyncpa [#allocation3 + $0x1], 0 }
   0x4   :  { %13 = vsyncpa [#allocation4], 0 }
   0x5   :  { %15 = vsyncpa [#allocation4 + $0x1], 0  ;;  %s763_s12 = smov 0   ;;  %s765_s13 = smov 0  }
   0x6   :  { %s767_s14 = smov 0   ;;  %s769_s15 = smov 0  }
   0x7   :  { %s771_s16 = smov 0   ;;  %s773_s17 = smov 0  }
   0x8 LB: > { %s445_s18 = sadd.s32 4294967295, %s733_s17   ;;  %s446_s19 = sadd.s32 4294967294, %s733_s17   ;;  %s733_s17 = sphi %s773_s17, %s21_s17   ;;  %s729_s16 = sphi %s771_s16, %s1045_s16   ;;  %s725_s15 = sphi %s769_s15, %s1044_s15   ;;  %s721_s14 = sphi %s767_s14, %s1043_s14   ;;  %s717_s13 = sphi %s765_s13, %s1042_s13   ;;  %s713_s12 = sphi %s763_s12, %s1041_s12  }
   0x9   : > { %s84_s20 = sadd.s32 1, %s721_s14  ;;  %p91_p0 = scmp.ne.s32.totalorder %s721_s14, %s717_s13 }
   0xa   : > { %p92_p1 = scmp.eq.s32.totalorder %s733_s17, 0  ;;  %p97_p2 = scmp.ne.s32.totalorder %s717_s13, %s713_s12 }
   0xb   : > { %p801_p3 = scmp.eq.s32.totalorder %s445_s18, 0  ;;  %p123_p4 = scmp.eq.s32.totalorder %s445_s18, 1 }
   0xc   : > { %p93_p5 = por %p92_p1, %p91_p0  ;;  %p129_p6 = scmp.eq.s32.totalorder %s446_s19, 1 }
   0xd   : > { %s1028_s21 = scalar_select %p801_p3, 1, 0 }
   0xe   : > { %p807_p7 = por %p801_p3, %p97_p2  ;;  %p811_p8 = por %p123_p4, %p91_p0 }
   0xf   : > { %p815_p9 = por %p129_p6, %p97_p2  ;;  %p447_p10 = scmp.ge.s32.totalorder %s733_s17, 1 }
  0x10   : > { %s1029_s22 = scalar_select %p807_p7, 1, 0 }
  0x11   : > { %s1030_s23 = scalar_select %p811_p8, 1, 0 }
  0x12   : > { %s1031_s24 = scalar_select %p815_p9, 1, 0 }
  0x13   : > { %p136_p11 = scmp.lt.s32.totalorder %s733_s17, 3  ;;  %p519_p1 = scmp.lt.s32.totalorder %s733_s17, 2 }
  0x14   : > { %s158_s28 = sshll.u32 %s1020_s1, 4  ;;  %s169_s4 = sand.u32 1, %s721_s14   ;;  %s159_s28 = int_to_ptr.vmem [resolvable:$true] %s158_s28 }
  0x15   : > { %p822_p13 = pnand %p447_p10, %p136_p11  ;;  %p832_p4 = pnand %p519_p1, %p93_p5 }
  0x16   : > { %s33_s5 = sadd.s32 1, %s729_s16  ;;  %s585_s8 = scalar_lea.hbm %s1019_s0, 64 }
  0x17   : > { %p502_p0 = pneg %p822_p13  ;;  %p586_p5 = scmp.ne.s32.totalorder %s1019_s0, %s585_s8 }
  0x18   : > { %p592_p1 = scmp.lt.u32.totalorder %s585_s8, %s1019_s0 }
  0x19   : > { %p838_p2 = pnand %p502_p0, %p801_p3 }
  0x1b   : > { %p587_p6 = pneg %p838_p2 }
  0x1d   : > { %p588_p10 = pnand %p587_p6, %p586_p5 }
  0x1f   : > { %p589_p11 = pneg %p588_p10 }
  0x21   : > { %p594_p0 = pnand %p592_p1, %p589_p11 }
  0x23   : > { %597 = shalt.err (!%p594_p0)
}
  0x24   : > { %s735_s19 = smov [#allocation2]   ;;  %s598_s6 = scalar_lea.vmem %s159_s28, 16 }
  0x25   : > { %505 = dma.hbm_to_smem (!%p838_p2), %s1019_s0, 64, %s735_s19, [#allocation5]  }
  0x26   : > { %p599_p12 = scmp.ne.s32.totalorder %s159_s28, %s598_s6  ;;  %p606_p7 = scmp.lt.s32.totalorder %s159_s28, %s159_s28 }
  0x27   : > { %p607_p5 = scmp.lt.s32.totalorder %s598_s6, %s598_s6 }
  0x28   : > { %p601_p9 = pnand %p599_p12, %p587_p6 }
  0x29   : > { %p608_p10 = por %p607_p5, %p606_p7 }
  0x2a   : > { %p602_p8 = pneg %p601_p9 }
  0x2c   : > { %p609_p3 = pnand %p608_p10, %p602_p8 }
  0x2e   : > { %612 = shalt.err (!%p609_p3)
}
  0x2f   : > { %s736_s7 = smov [#allocation7]   ;;  %p35_p11 = scmp.ge.s32.totalorder %s33_s5, 2 }
  0x30   : > { %508 = dma.vmem_to_smem (!%p838_p2), %s159_s28, 16, %s736_s7, [#allocation6]  }
  0x31   : > { %s451_s8 = sshll.u32 %s169_s4, 3  ;;  %s488_s9 = sshll.u32 %s729_s16, 7 }
  0x32   : > { %s1047_s5 = smov (%p35_p11, %s33_s5), 0  ;;  %s870_s30 = scalar_lea.hbm %s1021_s2, %s488_s9 }
  0x33   : > { %s79_s18 = ssub.s32 %s729_s16, %s1047_s5  ;;  %s173_s19 = scalar_lea.vmem [#allocation8], %s451_s8 }
  0x34   : > { %s181_s28 = sshll.u32 %s173_s19, 4  ;;  %p82_p3 = scmp.eq.s32.totalorder %s79_s18, 0  ;;  %s874_s28 = int_to_ptr.vmem [resolvable:$true] %s181_s28 }
  0x35   : > { %s883_s27 = scalar_lea.sflag [#allocation3], %s169_s4  ;;  %s613_s6 = scalar_lea.hbm %s870_s30, 128 }
  0x36   : > { %s879_s26 = scalar_select %p82_p3, %s721_s14, %s84_s20  }
  0x37   : > { %p614_p7 = scmp.ne.s32.totalorder %s870_s30, %s613_s6  ;;  %p615_p8 = pneg %p832_p4 }
  0x38   : > { %s618_s9 = scalar_lea.hbm %s1021_s2, 256  ;;  %p619_p2 = scmp.lt.u32.totalorder %s870_s30, %s1021_s2 }
  0x39   : > { %p616_p9 = pnand %p615_p8, %p614_p7  ;;  %p620_p6 = scmp.lt.u32.totalorder %s618_s9, %s613_s6 }
  0x3a   : > { %p622_p0 = scmp.lt.u32.totalorder %s613_s6, %s870_s30 }
  0x3b   : > { %p617_p12 = pneg %p616_p9  ;;  %p621_p1 = por %p620_p6, %p619_p2 }
  0x3d   : > { %p623_p5 = por %p622_p0, %p621_p1 }
  0x3f   : > { %p624_p10 = pnand %p623_p5, %p617_p12 }
  0x41   : > { %627 = shalt.err (!%p624_p10)
}
  0x42   : > { %s628_s20 = scalar_lea.vmem %s874_s28, 128  ;;  %s737_s4 = smov [#allocation8]  }
  0x43   : > { %p629_p11 = scmp.ne.s32.totalorder %s874_s28, %s628_s20  ;;  %s633_s18 = sshll.u32 %s737_s4, 4  ;;  %s634_s18 = int_to_ptr.vmem [resolvable:$false] %s633_s18 }
  0x44   : > { %s635_s19 = scalar_lea.vmem %s634_s18, 256  ;;  %p636_p9 = scmp.lt.s32.totalorder %s874_s28, %s634_s18 }
  0x45   : > { %p631_p3 = pnand %p629_p11, %p615_p8  ;;  %p637_p2 = scmp.lt.s32.totalorder %s635_s19, %s628_s20 }
  0x47   : > { %p632_p7 = pneg %p631_p3  ;;  %p638_p6 = por %p637_p2, %p636_p9 }
  0x49   : > { %p639_p1 = pnand %p638_p6, %p632_p7 }
  0x4b   : > { %642 = shalt.err (!%p639_p1)
}
  0x4c   : > { %s738_s6 = smov 32   ;;  %s739_s7 = smov 2  }
  0x4d   : > { %512 = dma.hbm_to_vmem [thread:$0]  (!%p832_p4), %s870_s30, 128, %s874_s28, %s883_s27, %s738_s6, %s738_s6, %s739_s7  }
  0x4e   : > { %193 = sbr.rel (%p822_p13) target bundleno = 146 (0x92), region = 32  ;;  %p1035_p8 = scmp.ne.s32.totalorder (!%p822_p13), %s1028_s21, 0 }
  0x55   : > { %696 = dma.done.wait (%p1035_p8), [#allocation5], 64  }
  0x56   : > { %698 = vsyncadd (%p1035_p8), [#allocation5], 4294967232 }
  0x57   : > { %700 = dma.done.wait (%p1035_p8), [#allocation6], 16  }
  0x58   : > { %702 = vsyncadd (%p1035_p8), [#allocation6], 4294967280  ;;  %s922_s8 = sand.u32 1, %s717_s13   ;;  %p1036_p13 = scmp.ne.s32.totalorder %s1029_s22, 0 }
  0x59   : > { %s1027_s25 = sshll.u32 %s922_s8, 3  ;;  %s204_s29 = scalar_lea.sflag [#allocation3], %s922_s8 }
  0x5a   : > { %s207_s30 = scalar_lea.vmem [#allocation8], %s1027_s25 }
  0x5b   : > { %704 = dma.done.wait (%p1036_p13), %s204_s29, 128  }
  0x5c   : > { %706 = vsyncadd (%p1036_p13), %s204_s29, 4294967168 }
  0x5d   : > { %212 = sfence }
  0x5e   : > { %s238_s28 = sld [smem:[#allocation2]]  ;;  %v231_v0 = vld [vmem:[%s207_s30] sm:$0x3]  ;;  %s465_s10 = sld [smem:[#allocation2 + $0x1]]  ;;  %v459_v1 = vld [vmem:[%s207_s30 + $0x2] sm:$0x3] }
  0x5f   : > { %s462_s21 = sld [smem:[#allocation2 + $0x80]]  ;;  %s466_s20 = sld [smem:[#allocation2 + $0x81]]  ;;  %v460_v2 = vld [vmem:[%s207_s30 + $0x4] sm:$0x3]  ;;  %v461_v4 = vld [vmem:[%s207_s30 + $0x6] sm:$0x3] }
  0x60   : > { %s463_s27 = sld [smem:[#allocation2 + $0x100]]  ;;  %s934_s4 = sld [smem:[#allocation2 + $0x101]] }
  0x61   : > { %s464_s9 = sld [smem:[#allocation2 + $0x180]]  ;;  %s468_s18 = sld [smem:[#allocation2 + $0x181]] }
  0x62   : > { %s932_s11 = sld [smem:[#allocation7]]  ;;  %s936_s19 = sld [smem:[#allocation7 + $0x1]] }
  0x63   : > { %s938_s22 = sld [smem:[#allocation2 + $0x2]]  ;;  %s942_s25 = sld [smem:[#allocation2 + $0x3]] }
  0x64   : > { %v239_v3 = vstv %s238_s28  ;;  %s472_s6 = sld [smem:[#allocation2 + $0x82]]  ;;  %v259_v11 = vstv %s465_s10  ;;  %s944_s28 = sld [smem:[#allocation2 + $0x83]] }
  0x65   : > { %v240_v5 = vmul.f32 %v239_v3, %v231_v0  ;;  %v242_v6 = vstv %s462_s21  ;;  %s473_s7 = sld [smem:[#allocation2 + $0x102]]  ;;  %v260_v14 = vmul.f32 %v259_v11, %v231_v0  ;;  %v262_v15 = vstv %s466_s20  ;;  %s946_s30 = sld [smem:[#allocation2 + $0x103]] }
  0x66   : > { %v246_v7 = vstv %s463_s27  ;;  %v243_v8 = vmul.f32 %v459_v1, %v242_v6  ;;  %s940_s29 = sld [smem:[#allocation2 + $0x182]]  ;;  %s948_s21 = sld [smem:[#allocation2 + $0x183]]  ;;  %v263_v16 = vmul.f32 %v459_v1, %v262_v15  ;;  %v266_v17 = vstv %s934_s4 }
  0x67   : > { %v247_v9 = vmul.f32 %v460_v2, %v246_v7  ;;  %v250_v10 = vstv %s464_s9  ;;  %v270_v18 = vstv %s468_s18  ;;  %s951_s27 = sld [smem:[#allocation7 + $0x2]]  ;;  %v267_v21 = vmul.f32 %v460_v2, %v266_v17  ;;  %s481_s9 = sld [smem:[#allocation7 + $0x3]] }
  0x68   : > { %v244_v12 = vadd.f32 %v243_v8, %v240_v5  ;;  %v251_v13 = vmul.f32 %v461_v4, %v250_v10  ;;  %v254_v20 = vstv %s932_s11  ;;  %v271_v22 = vmul.f32 %v461_v4, %v270_v18  ;;  %s489_s20 = sshll.u32 %s725_s15, 7  ;;  %p1038_p12 = scmp.ne.s32.totalorder %s1030_s23, 0 }
  0x69   : > { %v264_v23 = vadd.f32 %v263_v16, %v260_v14  ;;  %v280_v24 = vstv %s938_s22  ;;  %v274_v32 = vstv %s936_s19  ;;  %v301_v34 = vstv %s942_s25  ;;  %s1037_s25 = sshll.u32 %s922_s8, 3  ;;  %s970_s19 = scalar_lea.hbm %s1022_s3, %s489_s20 }
  0x6a   : > { %v248_v19 = vadd.f32 %v247_v9, %v244_v12  ;;  %v283_v25 = vstv %s472_s6  ;;  %v281_v28 = vmul.f32 %v280_v24, %v231_v0  ;;  %v302_v38 = vmul.f32 %v301_v34, %v231_v0  ;;  %s230_s10 = scalar_lea.vmem [#allocation9], %s1037_s25  ;;  %s322_s22 = scalar_lea.sflag [#allocation4], %s922_s8 }
  0x6b   : > { %v287_v26 = vstv %s473_s7  ;;  %v284_v29 = vmul.f32 %v459_v1, %v283_v25  ;;  %v268_v31 = vadd.f32 %v267_v21, %v264_v23  ;;  %v304_v40 = vstv %s944_s28  ;;  %s336_s11 = sshll.u32 %s230_s10, 4  ;;  %s740_s15 = smov [#allocation9]   ;;  %s965_s11 = int_to_ptr.vmem [resolvable:$true] %s336_s11 }
  0x6c   : > { %v252_v27 = vadd.f32 %v251_v13, %v248_v19  ;;  %v288_v30 = vmul.f32 %v460_v2, %v287_v26  ;;  %v291_v33 = vstv %s940_s29  ;;  %v308_v41 = vstv %s946_s30  ;;  %s643_s6 = scalar_lea.vmem %s965_s11, 128  ;;  %s647_s7 = sshll.u32 %s740_s15, 4  ;;  %s648_s7 = int_to_ptr.vmem [resolvable:$false] %s647_s7 }
  0x6d   : > { %v285_v36 = vadd.f32 %v284_v29, %v281_v28  ;;  %v292_v37 = vmul.f32 %v461_v4, %v291_v33  ;;  %v272_v39 = vadd.f32 %v271_v22, %v268_v31  ;;  %v312_v42 = vstv %s948_s21  ;;  %p644_p4 = scmp.ne.s32.totalorder %s965_s11, %s643_s6  ;;  %s649_s29 = scalar_lea.vmem %s648_s7, 256 }
  0x6e   : > { %v255_v35 = vadd.f32 %v254_v20, %v252_v27  ;;  %v305_v44 = vmul.f32 %v459_v1, %v304_v40  ;;  %v309_v45 = vmul.f32 %v460_v2, %v308_v41  ;;  %v295_v47 = vstv %s951_s27  ;;  %p650_p10 = scmp.lt.s32.totalorder %s965_s11, %s648_s7  ;;  %p651_p11 = scmp.lt.s32.totalorder %s649_s29, %s643_s6 }
  0x6f   : > { %v289_v43 = vadd.f32 %v288_v30, %v285_v36  ;;  %v275_v46 = vadd.f32 %v274_v32, %v272_v39  ;;  %v313_v50 = vmul.f32 %v461_v4, %v312_v42  ;;  %v316_v53 = vstv %s481_s9  ;;  %p645_p0 = pnand %p644_p4, %p1038_p12 }
  0x70   : > { %577 = vtanh.f32 %v255_v35  ;;  %v306_v49 = vadd.f32 %v305_v44, %v302_v38  ;;  %p652_p3 = por %p651_p11, %p650_p10 }
  0x71   : > { %v293_v48 = vadd.f32 %v292_v37, %v289_v43  ;;  %579 = vtanh.f32 %v275_v46  ;;  %p646_p5 = pneg %p645_p0 }
  0x72   : > { %v310_v52 = vadd.f32 %v309_v45, %v306_v49 }
  0x73   : > { %v296_v51 = vadd.f32 %v295_v47, %v293_v48  ;;  %p653_p7 = pnand %p652_p3, %p646_p5 }
  0x74   : > { %v314_v54 = vadd.f32 %v313_v50, %v310_v52 }
  0x75   : > { %581 = vtanh.f32 %v296_v51 }
  0x76   : > { %v317_v55 = vadd.f32 %v316_v53, %v314_v54 }
  0x78   : > { %583 = vtanh.f32 %v317_v55 }
  0x7a   : > { %v578_v56 = vpop.eup %577 }
  0x7b   : > { %257 = vst [vmem:[%s230_s10] sm:$0x3] %v578_v56  ;;  %v580_v57 = vpop.eup %579 }
  0x7c   : > { %470 = vst [vmem:[%s230_s10 + $0x2] sm:$0x3] %v580_v57 }
  0x7f   : > { %v582_v58 = vpop.eup %581 }
  0x80   : > { %476 = vst [vmem:[%s230_s10 + $0x4] sm:$0x3] %v582_v58 }
  0x82   : > { %v584_v59 = vpop.eup %583 }
  0x83   : > { %482 = vst [vmem:[%s230_s10 + $0x6] sm:$0x3] %v584_v59 }
  0x84   : > { %656 = shalt.err (!%p653_p7)
}
  0x85   : > { %s657_s28 = scalar_lea.hbm %s970_s19, 128  ;;  %s661_s27 = scalar_lea.hbm %s1022_s3, 256 }
  0x86   : > { %p658_p9 = scmp.ne.s32.totalorder %s970_s19, %s657_s28  ;;  %p662_p1 = scmp.lt.u32.totalorder %s970_s19, %s1022_s3 }
  0x87   : > { %p663_p8 = scmp.lt.u32.totalorder %s661_s27, %s657_s28  ;;  %p665_p4 = scmp.lt.u32.totalorder %s657_s28, %s970_s19 }
  0x88   : > { %p659_p2 = pnand %p658_p9, %p1038_p12 }
  0x89   : > { %p664_p13 = por %p663_p8, %p662_p1 }
  0x8a   : > { %p660_p6 = pneg %p659_p2 }
  0x8b   : > { %p666_p0 = por %p665_p4, %p664_p13 }
  0x8d   : > { %p667_p5 = pnand %p666_p0, %p660_p6 }
  0x8f   : > { %670 = shalt.err (!%p667_p5)
}
  0x90   : > { %s741_s10 = smov 32   ;;  %s742_s20 = smov 2  }
  0x91   : > { %500 = dma.vmem_to_hbm [thread:$0]  (%p1038_p12), %s965_s11, 128, %s970_s19, %s322_s22, %s741_s10, %s741_s10, %s742_s20  }
  0x92 PF: > { %s351_s4 = sand.u32 1, %s713_s12   ;;  %p1039_p10 = scmp.ne.s32.totalorder %s1031_s24, 0 }
  0x93   : > { %p1040_p11 = scmp.ge.s32.totalorder %s733_s17, 2  ;;  %s352_s18 = scalar_lea.sflag [#allocation4], %s351_s4 }
  0x95   : > { %p514_p3 = pnand %p1040_p11, %p1039_p10 }
  0x97   : > { %708 = dma.done.wait (!%p514_p3), %s352_s18, 128  }
  0x98   : > { %710 = vsyncadd (!%p514_p3), %s352_s18, 4294967168  ;;  %s21_s17 = sadd.s32 1, %s733_s17   ;;  %s1041_s12 = smov %s717_s13 }
  0x99   : > { %p18_p7 = scmp.ge.s32.totalorder %s21_s17, 4   ;;  %s1042_s13 = smov %s721_s14 }
  0x9a   : > { %s1043_s14 = smov %s879_s26  ;;  %s1044_s15 = smov %s729_s16 }
  0x9b   : > { %s1045_s16 = smov %s1047_s5  ;;  %20 = sbr.rel (!%p18_p7) target bundleno = 8 (0x8), region = 93 }
  0xa2   :  { %357 = vsyncpa [#allocation3], 1 }
  0xa3   :  { %359 = vsyncpa [#allocation3 + $0x1], 1 }
  0xa4   :  { %360 = vsyncpa [#allocation4], 1 }
  0xa5   :  { %362 = vsyncpa [#allocation4 + $0x1], 1 }
  0xa6   :  { %363 = vsyncpa [#allocation5], 1 }
  0xa7   :  { %365 = vsyncpa [#allocation5 + $0x1], 1 }
  0xa8   :  { %366 = vsyncpa [#allocation6], 1 }
  0xa9   :  { %368 = vsyncpa [#allocation6 + $0x1], 1 }

</bundles_post_ra>
